<compile_context>
chip_gen: v7x
topology: tpu7x:2x2x1
jax: 0.10.0
libtpu: 0.0.40
codegen_flags: <defaults>
</compile_context>

<pallas_src>
import functools

import jax
import jax.numpy as jnp
import numpy as np
from jax import lax
from jax.experimental import pallas as pl
from jax.experimental.pallas import tpu as pltpu


def dense_layer_kernel(x_ref, w1_ref, b1_ref, w2_ref, b2_ref, o_ref, *, W):
    # x_ref : (Cin, H*W)      one image; channels on sublanes, pixels on lanes
    # w1_ref: (Cin, Cin)      1x1 conv weight, (out, in)
    # b1_ref: (Cin, 1)        1x1 conv bias (broadcast over lanes)
    # w2_ref: (G, 9*Cin)      3x3 conv weight, columns ordered tap-major / channel-minor
    # b2_ref: (G, 1)          3x3 conv bias
    # o_ref : (Cin+G, H*W)    output = concat([x, h], channel axis)
    Cin, HW = x_ref.shape

    x = x_ref[...]                                           # (Cin, HW)

    # ---- 1x1 conv + bias + ReLU: one channel matmul (f32 accumulate) ----
    h1 = jnp.dot(w1_ref[...], x, preferred_element_type=jnp.float32)
    h1 = jnp.maximum(h1 + b1_ref[...], 0.0)                  # (Cin, HW), f32
    # TODO(synk): training-mode dropout (p > 0) would go here via pltpu.prng_*;
    # eval-mode dropout is the identity, which is what we implement.

    # ---- 3x3 conv, padding=1: im2col in registers, one fused matmul ----
    # Zero-pad the flattened spatial axis by (W+1) on each side: vertical taps
    # (dy = +-1) then read zeros automatically at the top/bottom border, while
    # horizontal edge leakage (dx = +-1 wrapping across rows) is fixed with a
    # per-column mask.  No VMEM scratch, no (H+2, W+2) buffer.
    pad = W + 1
    zpad = jnp.zeros((Cin, pad), h1.dtype)
    h1p = jnp.concatenate([zpad, h1, zpad], axis=1)          # (Cin, HW + 2W + 2)

    col = lax.broadcasted_iota(jnp.int32, (1, HW), 1) % W
    left_ok = col > 0                                        # valid when dx == -1
    right_ok = col < (W - 1)                                 # valid when dx == +1

    taps = []
    for dy in (-1, 0, 1):
        for dx in (-1, 0, 1):
            start = pad + dy * W + dx                        # static offset
            win = h1p[:, start:start + HW]                   # (Cin, HW) static slice
            if dx == -1:
                win = jnp.where(left_ok, win, 0.0)
            elif dx == 1:
                win = jnp.where(right_ok, win, 0.0)
            taps.append(win)
    patch = jnp.concatenate(taps, axis=0)                    # (9*Cin, HW)

    h2 = jnp.dot(w2_ref[...], patch, preferred_element_type=jnp.float32)
    h2 = jnp.maximum(h2 + b2_ref[...], 0.0)                  # (G, HW)

    # ---- concat([x, h], channel axis): a single full-tile, lane-dense store ----
    o_ref[...] = jnp.concatenate([x, h2.astype(x.dtype)], axis=0).astype(o_ref.dtype)


def dense_layer_pallas(x_nchw, w1, b1, w2, b2):
    """x_nchw: (N, Cin, H, W).  w1: (Cin, Cin) in->out.  w2: (3, 3, Cin, G) in->out.
    Returns (N, Cin+G, H, W), matching the PyTorch module output."""
    N, Cin, H, W = x_nchw.shape
    G = w2.shape[-1]
    HW = H * W

    # Free (contiguous) reshapes only -- stay in NCHW end to end.
    x_flat = x_nchw.reshape(N, Cin, HW)
    w1_oi = jnp.transpose(w1)                                # (out, in), tiny
    # (3, 3, Cin, G) -> (G, 9*Cin), columns ordered (tap, channel) to match the kernel.
    w2_mat = jnp.transpose(w2.reshape(9, Cin, G), (2, 0, 1)).reshape(G, 9 * Cin)
    b1_col = b1.reshape(Cin, 1)
    b2_col = b2.reshape(G, 1)

    kernel = functools.partial(dense_layer_kernel, W=W)

    out_flat = pl.pallas_call(
        kernel,
        out_shape=jax.ShapeDtypeStruct((N, Cin + G, HW), x_nchw.dtype),
        grid_spec=pltpu.PrefetchScalarGridSpec(
            num_scalar_prefetch=0,
            grid=(N,),                                       # N=2: both v7x TCs busy
            in_specs=[
                pl.BlockSpec((None, Cin, HW), lambda b: (b, 0, 0)),
                pl.BlockSpec((Cin, Cin), lambda b: (0, 0)),
                pl.BlockSpec((Cin, 1), lambda b: (0, 0)),
                pl.BlockSpec((G, 9 * Cin), lambda b: (0, 0)),
                pl.BlockSpec((G, 1), lambda b: (0, 0)),
            ],
            out_specs=pl.BlockSpec((None, Cin + G, HW), lambda b: (b, 0, 0)),
        ),
        compiler_params=pltpu.CompilerParams(
            dimension_semantics=("parallel",),
            vmem_limit_bytes=32 * 1024 * 1024),
    )(x_flat, w1_oi, b1_col, w2_mat, b2_col)

    return out_flat.reshape(N, Cin + G, H, W)


def dense_layer_ref(x_nchw, w1, b1, w2, b2):
    """Pure-JAX reference of the PyTorch forward (eval mode)."""
    # 1x1 conv: PyTorch weight OIHW = w1.T[:, :, None, None]
    h = lax.conv_general_dilated(
        x_nchw, jnp.transpose(w1)[:, :, None, None],
        window_strides=(1, 1), padding="VALID",
        dimension_numbers=("NCHW", "OIHW", "NCHW"))
    h = jnp.maximum(h + b1[None, :, None, None], 0.0)
    # 3x3 conv: PyTorch weight OIHW = transpose(w2, (3, 2, 0, 1))
    h = lax.conv_general_dilated(
        h, jnp.transpose(w2, (3, 2, 0, 1)),
        window_strides=(1, 1), padding=((1, 1), (1, 1)),
        dimension_numbers=("NCHW", "OIHW", "NCHW"))
    h = jnp.maximum(h + b2[None, :, None, None], 0.0)
    return jnp.concatenate([x_nchw, h], axis=1)


if __name__ == "__main__":
    # Small shapes consistent with the module: batch=2, in_channels=4,
    # growth=4, spatial=16x16, dropout=0.0 (eval mode => identity anyway).
    N, Cin, H, W, G = 2, 4, 16, 16, 4

    key = jax.random.PRNGKey(0)
    kx, kw1, kb1, kw2, kb2 = jax.random.split(key, 5)
    x = jax.random.normal(kx, (N, Cin, H, W), jnp.float32)
    w1 = jax.random.normal(kw1, (Cin, Cin), jnp.float32) * 0.3      # (in, out)
    b1 = jax.random.normal(kb1, (Cin,), jnp.float32) * 0.1
    w2 = jax.random.normal(kw2, (3, 3, Cin, G), jnp.float32) * 0.2  # (kh, kw, in, out)
    b2 = jax.random.normal(kb2, (G,), jnp.float32) * 0.1

    out = dense_layer_pallas(x, w1, b1, w2, b2)
    out = jax.block_until_ready(out)

    ref = dense_layer_ref(x, w1, b1, w2, b2)
    np.testing.assert_allclose(np.asarray(out), np.asarray(ref),
                               rtol=1e-4, atol=1e-4)
    assert out.shape == (N, Cin + G, H, W)
    print("KERNEL_OK")
</pallas_src>

<mosaic_0001>
module attributes {stable_mosaic.version = 11 : i64} {
  func.func @dense_layer_kernel(%arg0: i32, %arg1: memref<1x4x256xf32, #tpu.memory_space<vmem>>, %arg2: memref<4x4xf32, #tpu.memory_space<vmem>>, %arg3: memref<4x1xf32, #tpu.memory_space<vmem>>, %arg4: memref<4x36xf32, #tpu.memory_space<vmem>>, %arg5: memref<4x1xf32, #tpu.memory_space<vmem>>, %arg6: memref<1x8x256xf32, #tpu.memory_space<vmem>>) attributes {dimension_semantics = [#tpu.dimension_semantics<parallel>], iteration_bounds = array<i64: 2>, scalar_prefetch = 0 : i64, scratch_operands = 0 : i64, tpu.core_type = #tpu.core_type<tc>, window_params = [{transform_indices = @transform_0, window_bounds = array<i64: 1, 4, 256>}, {pipeline_mode = #tpu.pipeline_mode<synchronous>, transform_indices = @transform_1, window_bounds = array<i64: 4, 4>}, {pipeline_mode = #tpu.pipeline_mode<synchronous>, transform_indices = @transform_2, window_bounds = array<i64: 4, 1>}, {pipeline_mode = #tpu.pipeline_mode<synchronous>, transform_indices = @transform_3, window_bounds = array<i64: 4, 36>}, {pipeline_mode = #tpu.pipeline_mode<synchronous>, transform_indices = @transform_4, window_bounds = array<i64: 4, 1>}, {transform_indices = @transform_5, window_bounds = array<i64: 1, 8, 256>}]} {
    %c0 = arith.constant 0 : index
    %c0_0 = arith.constant 0 : index
    %c0_1 = arith.constant 0 : index
    %0 = vector.load %arg1[%c0, %c0_0, %c0_1] : memref<1x4x256xf32, #tpu.memory_space<vmem>>, vector<1x4x256xf32>
    %1 = vector.shape_cast %0 : vector<1x4x256xf32> to vector<4x256xf32>
    %c0_2 = arith.constant 0 : index
    %c0_3 = arith.constant 0 : index
    %2 = vector.load %arg2[%c0_2, %c0_3] : memref<4x4xf32, #tpu.memory_space<vmem>>, vector<4x4xf32>
    %cst = arith.constant dense<0.000000e+00> : vector<4x256xf32>
    %3 = tpu.matmul %2, %1, %cst {dimension_numbers = #tpu.dot_dimension_numbers<[1], [0], [0], [1], [0, 0, 1, 1], [], []>} : vector<4x4xf32>, vector<4x256xf32>, vector<4x256xf32> -> vector<4x256xf32>
    %c0_4 = arith.constant 0 : index
    %c0_5 = arith.constant 0 : index
    %4 = vector.load %arg3[%c0_4, %c0_5] : memref<4x1xf32, #tpu.memory_space<vmem>>, vector<4x1xf32>
    %5 = vector.broadcast %4 : vector<4x1xf32> to vector<4x256xf32>
    %6 = arith.addf %3, %5 : vector<4x256xf32>
    %cst_6 = arith.constant 0.000000e+00 : f32
    %7 = vector.broadcast %cst_6 : f32 to vector<4x256xf32>
    %8 = arith.maximumf %6, %7 : vector<4x256xf32>
    %cst_7 = arith.constant 0.000000e+00 : f32
    %9 = vector.broadcast %cst_7 : f32 to vector<4x17xf32>
    %10 = tpu.concatenate %9, %8, %9 in 1 : vector<4x17xf32>, vector<4x256xf32>, vector<4x17xf32> -> vector<4x290xf32>
    %11 = tpu.iota {dimensions = array<i32: 1>} : vector<1x256xi32>
    %c16_i32 = arith.constant 16 : i32
    %c0_i32 = arith.constant 0 : i32
    %12 = arith.cmpi eq, %c16_i32, %c0_i32 : i32
    %c1_i32 = arith.constant 1 : i32
    %13 = arith.select %12, %c1_i32, %c16_i32 : i32
    %14 = vector.broadcast %13 : i32 to vector<1x256xi32>
    %15 = arith.remsi %11, %14 : vector<1x256xi32>
    %c0_i32_8 = arith.constant 0 : i32
    %16 = vector.broadcast %c0_i32_8 : i32 to vector<1x256xi32>
    %17 = arith.cmpi ne, %15, %16 : vector<1x256xi32>
    %c0_i32_9 = arith.constant 0 : i32
    %18 = vector.broadcast %c0_i32_9 : i32 to vector<1x256xi32>
    %19 = arith.cmpi slt, %15, %18 : vector<1x256xi32>
    %c0_i32_10 = arith.constant 0 : i32
    %20 = arith.cmpi slt, %13, %c0_i32_10 : i32
    %21 = vector.broadcast %20 : i1 to vector<1x256xi1>
    %22 = vector.broadcast %21 : vector<1x256xi1> to vector<1x256xi1>
    %23 = arith.xori %19, %22 : vector<1x256xi1>
    %24 = arith.andi %23, %17 : vector<1x256xi1>
    %25 = vector.broadcast %13 : i32 to vector<1x256xi32>
    %26 = arith.addi %15, %25 : vector<1x256xi32>
    %27 = arith.select %24, %26, %15 : vector<1x256xi1>, vector<1x256xi32>
    %c0_i32_11 = arith.constant 0 : i32
    %28 = vector.broadcast %c0_i32_11 : i32 to vector<1x256xi32>
    %29 = arith.cmpi sgt, %27, %28 : vector<1x256xi32>
    %c15_i32 = arith.constant 15 : i32
    %30 = vector.broadcast %c15_i32 : i32 to vector<1x256xi32>
    %31 = arith.cmpi slt, %27, %30 : vector<1x256xi32>
    %32 = vector.extract_strided_slice %10 {offsets = [0, 0], sizes = [4, 256], strides = [1, 1]} : vector<4x290xf32> to vector<4x256xf32>
    %cst_12 = arith.constant 0.000000e+00 : f32
    %33 = vector.shape_cast %29 : vector<1x256xi1> to vector<1x256xi1>
    %34 = vector.broadcast %33 : vector<1x256xi1> to vector<4x256xi1>
    %35 = vector.broadcast %cst_12 : f32 to vector<4x256xf32>
    %36 = arith.select %34, %32, %35 : vector<4x256xi1>, vector<4x256xf32>
    %37 = vector.extract_strided_slice %10 {offsets = [0, 1], sizes = [4, 256], strides = [1, 1]} : vector<4x290xf32> to vector<4x256xf32>
    %38 = vector.extract_strided_slice %10 {offsets = [0, 2], sizes = [4, 256], strides = [1, 1]} : vector<4x290xf32> to vector<4x256xf32>
    %cst_13 = arith.constant 0.000000e+00 : f32
    %39 = vector.shape_cast %31 : vector<1x256xi1> to vector<1x256xi1>
    %40 = vector.broadcast %39 : vector<1x256xi1> to vector<4x256xi1>
    %41 = vector.broadcast %cst_13 : f32 to vector<4x256xf32>
    %42 = arith.select %40, %38, %41 : vector<4x256xi1>, vector<4x256xf32>
    %43 = vector.extract_strided_slice %10 {offsets = [0, 16], sizes = [4, 256], strides = [1, 1]} : vector<4x290xf32> to vector<4x256xf32>
    %cst_14 = arith.constant 0.000000e+00 : f32
    %44 = vector.shape_cast %29 : vector<1x256xi1> to vector<1x256xi1>
    %45 = vector.broadcast %44 : vector<1x256xi1> to vector<4x256xi1>
    %46 = vector.broadcast %cst_14 : f32 to vector<4x256xf32>
    %47 = arith.select %45, %43, %46 : vector<4x256xi1>, vector<4x256xf32>
    %48 = vector.extract_strided_slice %10 {offsets = [0, 17], sizes = [4, 256], strides = [1, 1]} : vector<4x290xf32> to vector<4x256xf32>
    %49 = vector.extract_strided_slice %10 {offsets = [0, 18], sizes = [4, 256], strides = [1, 1]} : vector<4x290xf32> to vector<4x256xf32>
    %cst_15 = arith.constant 0.000000e+00 : f32
    %50 = vector.shape_cast %31 : vector<1x256xi1> to vector<1x256xi1>
    %51 = vector.broadcast %50 : vector<1x256xi1> to vector<4x256xi1>
    %52 = vector.broadcast %cst_15 : f32 to vector<4x256xf32>
    %53 = arith.select %51, %49, %52 : vector<4x256xi1>, vector<4x256xf32>
    %54 = vector.extract_strided_slice %10 {offsets = [0, 32], sizes = [4, 256], strides = [1, 1]} : vector<4x290xf32> to vector<4x256xf32>
    %cst_16 = arith.constant 0.000000e+00 : f32
    %55 = vector.shape_cast %29 : vector<1x256xi1> to vector<1x256xi1>
    %56 = vector.broadcast %55 : vector<1x256xi1> to vector<4x256xi1>
    %57 = vector.broadcast %cst_16 : f32 to vector<4x256xf32>
    %58 = arith.select %56, %54, %57 : vector<4x256xi1>, vector<4x256xf32>
    %59 = vector.extract_strided_slice %10 {offsets = [0, 33], sizes = [4, 256], strides = [1, 1]} : vector<4x290xf32> to vector<4x256xf32>
    %60 = vector.extract_strided_slice %10 {offsets = [0, 34], sizes = [4, 256], strides = [1, 1]} : vector<4x290xf32> to vector<4x256xf32>
    %cst_17 = arith.constant 0.000000e+00 : f32
    %61 = vector.shape_cast %31 : vector<1x256xi1> to vector<1x256xi1>
    %62 = vector.broadcast %61 : vector<1x256xi1> to vector<4x256xi1>
    %63 = vector.broadcast %cst_17 : f32 to vector<4x256xf32>
    %64 = arith.select %62, %60, %63 : vector<4x256xi1>, vector<4x256xf32>
    %65 = tpu.concatenate %36, %37, %42, %47, %48, %53, %58, %59, %64 in 0 : vector<4x256xf32>, vector<4x256xf32>, vector<4x256xf32>, vector<4x256xf32>, vector<4x256xf32>, vector<4x256xf32>, vector<4x256xf32>, vector<4x256xf32>, vector<4x256xf32> -> vector<36x256xf32>
    %c0_18 = arith.constant 0 : index
    %c0_19 = arith.constant 0 : index
    %66 = vector.load %arg4[%c0_18, %c0_19] : memref<4x36xf32, #tpu.memory_space<vmem>>, vector<4x36xf32>
    %cst_20 = arith.constant dense<0.000000e+00> : vector<4x256xf32>
    %67 = tpu.matmul %66, %65, %cst_20 {dimension_numbers = #tpu.dot_dimension_numbers<[1], [0], [0], [1], [0, 0, 1, 1], [], []>} : vector<4x36xf32>, vector<36x256xf32>, vector<4x256xf32> -> vector<4x256xf32>
    %c0_21 = arith.constant 0 : index
    %c0_22 = arith.constant 0 : index
    %68 = vector.load %arg5[%c0_21, %c0_22] : memref<4x1xf32, #tpu.memory_space<vmem>>, vector<4x1xf32>
    %69 = vector.broadcast %68 : vector<4x1xf32> to vector<4x256xf32>
    %70 = arith.addf %67, %69 : vector<4x256xf32>
    %cst_23 = arith.constant 0.000000e+00 : f32
    %71 = vector.broadcast %cst_23 : f32 to vector<4x256xf32>
    %72 = arith.maximumf %70, %71 : vector<4x256xf32>
    %73 = tpu.concatenate %1, %72 in 0 : vector<4x256xf32>, vector<4x256xf32> -> vector<8x256xf32>
    %c0_24 = arith.constant 0 : index
    %c0_25 = arith.constant 0 : index
    %c0_26 = arith.constant 0 : index
    %74 = vector.load %arg6[%c0_24, %c0_25, %c0_26] : memref<1x8x256xf32, #tpu.memory_space<vmem>>, vector<1x8x256xf32>
    %75 = vector.shape_cast %74 : vector<1x8x256xf32> to vector<8x256xf32>
    %76 = vector.shape_cast %73 : vector<8x256xf32> to vector<1x8x256xf32>
    tpu.vector_store %arg6[%c0_24, %c0_25, %c0_26], %76 {strides = array<i32>} : memref<1x8x256xf32, #tpu.memory_space<vmem>>, vector<1x8x256xf32>,
    return
  }
  func.func @transform_0(%arg0: i32) -> (i32, i32, i32) {
    %c0_i32 = arith.constant 0 : i32
    %c0_i32_0 = arith.constant 0 : i32
    %c0_i32_1 = arith.constant 0 : i32
    return %arg0, %c0_i32, %c0_i32_0 : i32, i32, i32
  }
  func.func @transform_1(%arg0: i32) -> (i32, i32) {
    %c0_i32 = arith.constant 0 : i32
    %c0_i32_0 = arith.constant 0 : i32
    %c0_i32_1 = arith.constant 0 : i32
    return %c0_i32, %c0_i32_0 : i32, i32
  }
  func.func @transform_2(%arg0: i32) -> (i32, i32) {
    %c0_i32 = arith.constant 0 : i32
    %c0_i32_0 = arith.constant 0 : i32
    %c0_i32_1 = arith.constant 0 : i32
    return %c0_i32, %c0_i32_0 : i32, i32
  }
  func.func @transform_3(%arg0: i32) -> (i32, i32) {
    %c0_i32 = arith.constant 0 : i32
    %c0_i32_0 = arith.constant 0 : i32
    %c0_i32_1 = arith.constant 0 : i32
    return %c0_i32, %c0_i32_0 : i32, i32
  }
  func.func @transform_4(%arg0: i32) -> (i32, i32) {
    %c0_i32 = arith.constant 0 : i32
    %c0_i32_0 = arith.constant 0 : i32
    %c0_i32_1 = arith.constant 0 : i32
    return %c0_i32, %c0_i32_0 : i32, i32
  }
  func.func @transform_5(%arg0: i32) -> (i32, i32, i32) {
    %c0_i32 = arith.constant 0 : i32
    %c0_i32_0 = arith.constant 0 : i32
    %c0_i32_1 = arith.constant 0 : i32
    return %arg0, %c0_i32, %c0_i32_0 : i32, i32, i32
  }
}

</mosaic_0001>

<bundles_post_ra>
// kernel: tpu_custom_call.1
= control target key start
LH: loop header
LB: loop body
LE: loop exit
PB: predicated region body
PF: predicated region fallthrough
CT: control target
= control target key end

     0   :  { %10 = vsyncpa [#allocation3], 0  ;;  %s1227_s0 = inlined_call_operand.hbm [shape: f32[2,4,256], index: 0, kind: input, shape index: {}]   ;;  %s1228_s1 = inlined_call_operand.vmem [shape: f32[4,4], index: 1, kind: input, shape index: {}]   ;;  %s1229_s2 = inlined_call_operand.vmem [shape: f32[4,1], index: 2, kind: input, shape index: {}]   ;;  %s1230_s3 = inlined_call_operand.vmem [shape: f32[4,36], index: 3, kind: input, shape index: {}]   ;;  %s1231_s4 = inlined_call_operand.vmem [shape: f32[4,1], index: 4, kind: input, shape index: {}]   ;;  %s1232_s5 = inlined_call_operand.hbm [shape: f32[2,8,256], index: 5, kind: output, shape index: {}]  }
   0x1   :  { %12 = vsyncpa [#allocation3 + $0x1], 0 }
   0x2   :  { %13 = vsyncpa [#allocation4], 0 }
   0x3   :  { %15 = vsyncpa [#allocation4 + $0x1], 0  ;;  %s961_s18 = smov 0   ;;  %s963_s19 = smov 0  }
   0x4   :  { %s965_s20 = smov 0   ;;  %s967_s21 = smov 0  }
   0x5 LB: > { %s982_s22 = sadd.s32 4294967295, %s916_s21   ;;  %s696_s23 = sadd.s32 4294967294, %s916_s21   ;;  %s916_s21 = sphi %s967_s21, %s1255_s21   ;;  %s912_s20 = sphi %s965_s20, %s1254_s20   ;;  %s908_s19 = sphi %s963_s19, %s1253_s19   ;;  %s904_s18 = sphi %s961_s18, %s1252_s18  }
   0x6   : > { %s986_s24 = sadd.s32 1, %s916_s21   ;;  %s28_s25 = sadd.s32 1, %s912_s20 }
   0x7   : > { %s25_s26 = ssub.s32 %s916_s21, %s986_s24  ;;  %p35_p0 = scmp.ne.s32.totalorder %s912_s20, %s908_s19 }
   0x8   : > { %p26_p1 = scmp.eq.s32.totalorder %s25_s26, 0  ;;  %p36_p2 = scmp.eq.s32.totalorder %s916_s21, 0 }
   0x9   : > { %p41_p3 = scmp.ne.s32.totalorder %s908_s19, %s904_s18  ;;  %p42_p4 = scmp.eq.s32.totalorder %s982_s22, 0 }
   0xa   : > { %s998_s27 = scalar_select %p26_p1, %s912_s20, %s28_s25  }
   0xb   : > { %p1000_p5 = por %p36_p2, %p35_p0  ;;  %p1004_p6 = por %p42_p4, %p41_p3 }
   0xc   : > { %p149_p7 = scmp.eq.s32.totalorder %s982_s22, 1  ;;  %p155_p8 = scmp.eq.s32.totalorder %s696_s23, 1 }
   0xd   : > { %p738_p10 = scmp.lt.s32.totalorder %s916_s21, 2  ;;  %s187_s7 = sand.u32 1, %s912_s20  }
   0xe   : > { %p1011_p11 = por %p149_p7, %p35_p0  ;;  %p1015_p12 = por %p155_p8, %p41_p3 }
   0xf   : > { %s716_s8 = sshll.u32 %s916_s21, 7  ;;  %s699_s9 = sshll.u32 %s187_s7, 3 }
  0x10   : > { %s1236_s30 = scalar_select %p1011_p11, 1, 0 }
  0x11   : > { %s1237_s6 = scalar_select %p1015_p12, 1, 0 }
  0x12   : > { %s1024_s12 = scalar_lea.hbm %s1227_s0, %s716_s8  ;;  %s191_s13 = scalar_lea.vmem [#allocation2], %s699_s9 }
  0x13   : > { %s199_s14 = sshll.u32 %s191_s13, 4  ;;  %p1028_p13 = pnand %p738_p10, %p1000_p5  ;;  %s1032_s14 = int_to_ptr.vmem [resolvable:$true] %s199_s14 }
  0x14   : > { %s188_s16 = scalar_lea.sflag [#allocation3], %s187_s7  ;;  %s820_s17 = scalar_lea.hbm %s1024_s12, 128 }
  0x15   : > { %p821_p2 = scmp.ne.s32.totalorder %s1024_s12, %s820_s17  ;;  %p822_p3 = pneg %p1028_p13 }
  0x16   : > { %s825_s26 = scalar_lea.hbm %s1227_s0, 256  ;;  %p826_p5 = scmp.lt.u32.totalorder %s1024_s12, %s1227_s0 }
  0x17   : > { %p823_p4 = pnand %p822_p3, %p821_p2  ;;  %p827_p8 = scmp.lt.u32.totalorder %s825_s26, %s820_s17 }
  0x18   : > { %p829_p9 = scmp.lt.u32.totalorder %s820_s17, %s1024_s12 }
  0x19   : > { %p824_p7 = pneg %p823_p4  ;;  %p828_p10 = por %p827_p8, %p826_p5 }
  0x1b   : > { %p830_p0 = por %p829_p9, %p828_p10 }
  0x1d   : > { %p831_p1 = pnand %p830_p0, %p824_p7 }
  0x1f   : > { %834 = shalt.err (!%p831_p1)
}
  0x20   : > { %s835_s7 = scalar_lea.vmem %s1032_s14, 128  ;;  %s918_s9 = smov [#allocation2]  }
  0x21   : > { %p836_p2 = scmp.ne.s32.totalorder %s1032_s14, %s835_s7  ;;  %s840_s10 = sshll.u32 %s918_s9, 4  ;;  %s841_s10 = int_to_ptr.vmem [resolvable:$false] %s840_s10 }
  0x22   : > { %s842_s11 = scalar_lea.vmem %s841_s10, 256  ;;  %p843_p11 = scmp.lt.s32.totalorder %s1032_s14, %s841_s10 }
  0x23   : > { %p838_p4 = pnand %p836_p2, %p822_p3  ;;  %p844_p5 = scmp.lt.s32.totalorder %s842_s11, %s835_s7 }
  0x25   : > { %p839_p12 = pneg %p838_p4  ;;  %p845_p8 = por %p844_p5, %p843_p11 }
  0x27   : > { %p846_p9 = pnand %p845_p8, %p839_p12 }
  0x29   : > { %849 = shalt.err (!%p846_p9)
}
  0x2a   : > { %733 = dma.hbm_to_vmem [thread:$0]  (!%p1028_p13), %s1024_s12, 128, %s1032_s14, %s188_s16  }
  0x2b   : > { %p1239_p0 = scmp.lt.s32.totalorder %s916_s21, 3  ;;  %p1240_p1 = scmp.ge.s32.totalorder %s916_s21, 1 }
  0x2d   : > { %p205_p3 = pnand %p1240_p1, %p1239_p0 }
  0x2e   : > { %s1066_s13 = sand.u32 (!%p205_p3), 1, %s908_s19  }
  0x2f   : > { %208 = sbr.rel (%p205_p3) target bundleno = 780 (0x30c), region = 40  ;;  %s703_s17 = sshll.u32 (!%p205_p3), %s1066_s13, 3 }
  0x30   : > { %s211_s23 = scalar_lea.sflag (!%p205_p3), [#allocation3], %s1066_s13  ;;  %s214_s25 = scalar_lea.vmem (!%p205_p3), [#allocation2], %s703_s17 }
  0x36   : > { %895 = dma.done.wait (%p1004_p6), %s211_s23, 128  }
  0x37   : > { %897 = vsyncadd (%p1004_p6), %s211_s23, 4294967168  ;;  %v919_v0 = vmov 0.0   ;;  %v920_v1 = vmov 0   ;;  %v1074_v2 = vld [vmem:[%s214_s25] sm:$0xff]  ;;  %vm255_vm0 = vcmask 1043456   ;;  %vm251_vm1 = vcmask 31744  }
  0x38   : > { %324 = vmatprep.mubr.f32.mxu0 %v919_v0  ;;  %783 = vset.pattern.permute.xlu0 %v920_v1  ;;  %v243_v3 = vld [vmem:[%s1229_s2] sm:$0xf]  ;;  %v1081_v4 = vcombine.high %v1074_v2, %v1074_v2  ;;  %s921_s16 = smov 17   ;;  %vm339_vm2 = vcmask 138240   ;;  %s922_s26 = smov 112   ;;  %v346_v25 = vlaneseq  ;;  %vm408_vm3 = vcmask 916480  }
  0x39   : > { %591 = vmatprep.mubr.f32.mxu1 %v919_v0  ;;  %246 = vperm.xlu0 %783, %v243_v3   ;;  %v242_v5 = vld [vmem:[%s1228_s1] sm:$0xf]  ;;  %s923_s28 = smov 126   ;;  %s924_s8 = smov 110   ;;  %vm395_vm5 = vcmask 1031168   ;;  %vm421_vm6 = vcmask 900096  }
  0x3a   : > { %705 = vmatprep.subr.msk.mxu0 %vm255_vm0, %v1081_v4  ;;  %s925_s7 = smov 96   ;;  %s926_s9 = smov 111   ;;  %v511_v23 = vld [vmem:[%s1231_s4] sm:$0xf]  ;;  %v347_v28 = vand.u32 127, %v346_v25  ;;  %vm434_vm10 = vcmask 785408  }
  0x3b   : > { %706 = vmatpush1.msk.msra.mxu0 %vm255_vm0, %v1074_v2  ;;  %s927_s10 = smov 127   ;;  %s928_s11 = smov 95   ;;  %vm480_vm11 = vcmask 908288   ;;  %vm497_vm12 = vcmask 777216   ;;  %vm463_vm13 = vcmask 1039360   ;;  %vm447_vm14 = vcmask 769024  }
  0x3c   : > { %707 = vmatmul.mubr.msk.f32.vlgmr.msra.gmra.mrb[0].mxu0 %vm251_vm1, %v242_v5  ;;  %s929_s17 = smov 94   ;;  %v348_v31 = vadd.s32 128, %v347_v28  ;;  %v353_v33 = vand.u32 15, %v347_v28  ;;  %vm517_vm15 = vcmask 293888   ;;  %s704_s15 = sshll.u32 %s1066_s13, 4 }
  0x3d   : > { %s717_s29 = sshll.u32 %s982_s22, 8  ;;  %s612_s22 = scalar_lea.sflag [#allocation4], %s1066_s13 }
  0x3e   : > { %v360_v35 = vand.u32 15, %v348_v31  ;;  %vm1107_vm4 = vcmp.gt.s32.totalorder %v353_v33, 0  ;;  %vm1111_vm7 = vcmp.lt.s32.totalorder %v353_v33, 15  ;;  %p1249_p11 = scmp.ne.s32.totalorder %s1236_s30, 0 }
  0x40   : > { %vm1115_vm8 = vcmp.gt.s32.totalorder %v360_v35, 0  ;;  %vm1119_vm9 = vcmp.lt.s32.totalorder %v360_v35, 15 }
  0xb8   : > { %v247_v6 = vpop.permute.xlu0 %246 }
 0x10f   : > { %v326_v7 = vpop.f32.mrb[0].mxu0 }
 0x110   : > { %v327_v8 = vadd.f32 %v326_v7, %v247_v6  ;;  %v328_v9 = vpop.f32.mrb[1].mxu0 }
 0x111   : > { %v329_v10 = vadd.f32 %v328_v9, %v247_v6 }
 0x112   : > { %v331_v11 = vmax.f32 %v327_v8, 0.0 }
 0x113   : > { %v332_v12 = vmax.f32 %v329_v10, 0.0 }
 0x114   : > { %335 = vrot.lane.b32.xlu0 %v331_v11, %s921_s16 }
 0x115   : > { %337 = vrot.lane.b32.xlu1 %v332_v12, %s921_s16  ;;  %s240_s16 = scalar_lea.vmem [#allocation5], %s704_s15 }
 0x186   : > { %v336_v13 = vpop.permute.xlu0 %335 }
 0x187   : > { %v1090_v14 = vsel %vm339_vm2, 0.0, %v336_v13  ;;  %v338_v15 = vpop.permute.xlu1 %337 }
 0x188   : > { %v1092_v16 = vsel %vm339_vm2, %v336_v13, %v338_v15  ;;  %v345_v17 = vsel %vm339_vm2, %v338_v15, 0.0  ;;  %402 = vrot.lane.b32.xlu0 %v1090_v14, %s922_s26  ;;  %v454_v21 = vrot.slane %v1090_v14, 4  ;;  %v381_v51 = vsel %vm1107_vm4, %v1090_v14, 0.0 }
 0x189   : > { %v784_v18 = vpack.i.bf16 %v345_v17, %v1092_v16  ;;  %v455_v19 = vrot.slane %v1092_v16, 4  ;;  %v456_v20 = vrot.slane %v345_v17, 4 }
 0x18b   : > { %785 = vrot.lane.b32.xlu1 %v784_v18, %s922_s26  ;;  %v814_v22 = vpack.i.bf16 %v456_v20, %v455_v19  ;;  %s626_s26 = sshll.u32 %s240_s16, 4  ;;  %s1183_s26 = int_to_ptr.vmem [resolvable:$true] %s626_s26 }
 0x18c   : > { %389 = vrot.lane.b32.xlu0 %v1090_v14, %s923_s28 }
 0x18f   : > { %790 = vrot.lane.b32.xlu1 %v784_v18, %s923_s28 }
 0x190   : > { %415 = vrot.lane.b32.xlu0 %v1090_v14, %s924_s8 }
 0x193   : > { %800 = vrot.lane.b32.xlu1 %v784_v18, %s925_s7 }
 0x194   : > { %428 = vrot.lane.b32.xlu0 %v1090_v14, %s925_s7  ;;  %s1181_s7 = scalar_lea.hbm %s1232_s5, %s717_s29 }
 0x197   : > { %805 = vrot.lane.b32.xlu1 %v784_v18, %s926_s9 }
 0x198   : > { %795 = vrot.lane.b32.xlu0 %v784_v18, %s924_s8 }
 0x19b   : > { %457 = vrot.lane.b32.xlu1 %v454_v21, %s927_s10 }
 0x19c   : > { %815 = vrot.lane.b32.xlu0 %v814_v22, %s928_s11 }
 0x19f   : > { %810 = vrot.lane.b32.xlu1 %v814_v22, %s927_s10  ;;  %s930_s10 = smov [#allocation5]  }
 0x1a0   : > { %491 = vrot.lane.b32.xlu0 %v454_v21, %s928_s11  ;;  %s854_s11 = sshll.u32 %s930_s10, 4  ;;  %s855_s11 = int_to_ptr.vmem [resolvable:$false] %s854_s11 }
 0x1a1   : > { %p857_p7 = scmp.lt.s32.totalorder %s1183_s26, %s855_s11 }
 0x1a3   : > { %474 = vrot.lane.b32.xlu1 %v1090_v14, %s926_s9  ;;  %s850_s9 = scalar_lea.vmem %s1183_s26, 256 }
 0x1a4   : > { %445 = vrot.lane.b32.xlu0 %v345_v17, %s929_s17  ;;  %p851_p6 = scmp.ne.s32.totalorder %s1183_s26, %s850_s9 }
 0x1a6   : > { %p852_p12 = pnand %p851_p6, %p1249_p11 }
 0x1a7   : > { %443 = vrot.lane.b32.xlu1 %v1092_v16, %s929_s17 }
 0x1a8   : > { %514 = vperm.xlu0 %783, %v511_v23   ;;  %p853_p13 = pneg %p852_p12 }
 0x1ab   : > { %441 = vrot.lane.b32.xlu1 %v1090_v14, %s929_s17  ;;  %v382_v14 = vsel %vm1115_vm8, %v1092_v16, 0.0  ;;  %s856_s17 = scalar_lea.vmem %s855_s11, 512 }
 0x1ac   : > { %p858_p10 = scmp.lt.s32.totalorder %s856_s17, %s850_s9 }
 0x1ae   : > { %p859_p2 = por %p858_p10, %p857_p7 }
 0x1b0   : > { %p860_p4 = pnand %p859_p2, %p853_p13 }
 0x1fa   : > { %v403_v24 = vpop.permute.xlu0 %402 }
 0x1fd   : > { %v786_v26 = vpop.permute.xlu1 %785 }
 0x1fe   : > { %v390_v27 = vpop.permute.xlu0 %389  ;;  %v788_v36 = vunpack.i.h.bf16 %v786_v26  ;;  %v787_v37 = vunpack.i.l.bf16 %v786_v26 }
 0x200   : > { %v409_v46 = vsel %vm408_vm3, %v403_v24, %v787_v37  ;;  %v410_v47 = vsel %vm408_vm3, %v787_v37, %v788_v36 }
 0x201   : > { %v791_v29 = vpop.permute.xlu1 %790  ;;  %v414_v58 = vsel %vm1115_vm8, %v410_v47, 0.0  ;;  %v413_v60 = vsel %vm1107_vm4, %v409_v46, 0.0 }
 0x202   : > { %v416_v30 = vpop.permute.xlu0 %415  ;;  %v793_v38 = vunpack.i.h.bf16 %v791_v29  ;;  %v792_v39 = vunpack.i.l.bf16 %v791_v29  ;;  %v471_v8 = vrot.slane %v414_v58, 4  ;;  %v470_v10 = vrot.slane %v413_v60, 4 }
 0x204   : > { %v397_v50 = vsel %vm395_vm5, %v792_v39, %v793_v38  ;;  %v396_v56 = vsel %vm395_vm5, %v390_v27, %v792_v39 }
 0x205   : > { %v801_v32 = vpop.permute.xlu1 %800  ;;  %v401_v63 = vsel %vm1119_vm9, %v397_v50, 0.0  ;;  %v400_v5 = vsel %vm1111_vm7, %v396_v56, 0.0 }
 0x206   : > { %v429_v34 = vpop.permute.xlu0 %428  ;;  %v803_v52 = vunpack.i.h.bf16 %v801_v32  ;;  %v802_v53 = vunpack.i.l.bf16 %v801_v32  ;;  %v505_v19 = vsel %vm255_vm0, %v401_v63, %v471_v8  ;;  %v504_v20 = vsel %vm255_vm0, %v400_v5, %v470_v10 }
 0x208   : > { %v436_v6 = vsel %vm434_vm10, %v802_v53, %v803_v52  ;;  %v435_v15 = vsel %vm434_vm10, %v429_v34, %v802_v53 }
 0x209   : > { %v806_v41 = vpop.permute.xlu1 %805  ;;  %v440_v24 = vsel %vm1115_vm8, %v436_v6, 0.0  ;;  %v439_v36 = vsel %vm1107_vm4, %v435_v15, 0.0 }
 0x20a   : > { %v796_v42 = vpop.permute.xlu0 %795  ;;  %v808_v0 = vunpack.i.h.bf16 %v806_v41  ;;  %v807_v1 = vunpack.i.l.bf16 %v806_v41 }
 0x20b   : > { %v798_v48 = vunpack.i.h.bf16 %v796_v42  ;;  %v797_v49 = vunpack.i.l.bf16 %v796_v42 }
 0x20c   : > { %v482_v21 = vsel %vm480_vm11, %v807_v1, %v808_v0 }
 0x20d   : > { %v423_v54 = vsel %vm421_vm6, %v797_v49, %v798_v48  ;;  %v458_v55 = vpop.permute.xlu1 %457  ;;  %v422_v3 = vsel %vm421_vm6, %v416_v30, %v797_v49  ;;  %v510_v48 = vld [vmem:[%s1230_s3] sm:$0xf] }
 0x20e   : > { %v816_v57 = vpop.permute.xlu0 %815  ;;  %v427_v59 = vsel %vm1119_vm9, %v423_v54, 0.0  ;;  %v426_v18 = vsel %vm1111_vm7, %v422_v3, 0.0 }
 0x20f   : > { %v818_v61 = vunpack.i.h.bf16 %v816_v57  ;;  %v817_v62 = vunpack.i.l.bf16 %v816_v57  ;;  %v488_v9 = vrot.slane %v427_v59, 4  ;;  %v487_v29 = vrot.slane %v426_v18, 4 }
 0x211   : > { %v811_v7 = vpop.permute.xlu1 %810  ;;  %v499_v13 = vsel %vm497_vm12, %v817_v62, %v818_v61  ;;  %v507_v27 = vsel %vm255_vm0, %v482_v21, %v488_v9 }
 0x212   : > { %v813_v11 = vunpack.i.h.bf16 %v811_v7  ;;  %v812_v12 = vunpack.i.l.bf16 %v811_v7  ;;  %v492_v17 = vpop.permute.xlu0 %491  ;;  %v509_v28 = vsel %vm255_vm0, %v440_v24, %v499_v13 }
 0x213   : > { %v498_v33 = vsel %vm497_vm12, %v492_v17, %v817_v62  ;;  %v722_v35 = vpack.c.bf16 %v509_v28, %v507_v27 }
 0x214   : > { %v465_v22 = vsel %vm463_vm13, %v812_v12, %v813_v11  ;;  %v464_v23 = vsel %vm463_vm13, %v458_v55, %v812_v12  ;;  %v508_v39 = vsel %vm255_vm0, %v439_v36, %v498_v33 }
 0x215   : > { %v475_v16 = vpop.permute.xlu1 %474  ;;  %v503_v25 = vsel %vm255_vm0, %v382_v14, %v465_v22  ;;  %v502_v26 = vsel %vm255_vm0, %v381_v51, %v464_v23 }
 0x216   : > { %v481_v30 = vsel %vm480_vm11, %v475_v16, %v807_v1  ;;  %v718_v31 = vpack.c.bf16 %v505_v19, %v503_v25  ;;  %v720_v32 = vpack.c.bf16 %v504_v20, %v502_v26  ;;  %v446_v37 = vpop.permute.xlu0 %445 }
 0x217   : > { %v506_v34 = vsel %vm255_vm0, %v481_v30, %v487_v29 }
 0x218   : > { %719 = vmatprep.subr.bf16.mxu1 %v718_v31  ;;  %v724_v42 = vpack.c.bf16 %v508_v39, %v506_v34 }
 0x219   : > { %v444_v38 = vpop.permute.xlu1 %443  ;;  %721 = vmatpush1.bf16.msra.mxu1 %v720_v32 }
 0x21a   : > { %v449_v41 = vsel %vm447_vm14, %v444_v38, %v446_v37  ;;  %723 = vmatprep.subr.bf16.mxu1 %v722_v35 }
 0x21b   : > { %v453_v44 = vsel %vm1119_vm9, %v449_v41, 0.0 }
 0x21d   : > { %v442_v46 = vpop.permute.xlu1 %441  ;;  %725 = vmatpush1.bf16.msra.mxu1 %v724_v42 }
 0x21e   : > { %v448_v47 = vsel %vm447_vm14, %v442_v46, %v444_v38  ;;  %708 = vmatprep.subr.msk.mxu1 %vm255_vm0, %v453_v44 }
 0x21f   : > { %v452_v40 = vsel %vm1111_vm7, %v448_v47, 0.0 }
 0x221   : > { %709 = vmatpush1.msk.msra.mxu1 %vm255_vm0, %v452_v40 }
 0x222   : > { %710 = vmatmul.mubr.msk.f32.vlgmr.msra.gmra.mrb[0].mxu1 %vm517_vm15, %v510_v48 }
 0x227   : > { %v515_v45 = vpop.permute.xlu0 %514 }
 0x2f5   : > { %v593_v49 = vpop.f32.mrb[0].mxu1 }
 0x2f6   : > { %v594_v50 = vadd.f32 %v593_v49, %v515_v45  ;;  %v595_v51 = vpop.f32.mrb[1].mxu1 }
 0x2f7   : > { %v596_v52 = vadd.f32 %v595_v51, %v515_v45 }
 0x2f8   : > { %v598_v53 = vmax.f32 %v594_v50, 0.0 }
 0x2f9   : > { %v599_v54 = vmax.f32 %v596_v52, 0.0 }
 0x2fa   : > { %v603_v43 = vrot.slane %v598_v53, 4 }
 0x2fb   : > { %v604_v55 = vrot.slane %v599_v54, 4 }
 0x2fc   : > { %v607_v56 = vsel %vm255_vm0, %v1074_v2, %v603_v43 }
 0x2fd   : > { %609 = vst [vmem:[%s240_s16] sm:$0xff] %v607_v56  ;;  %v608_v57 = vsel %vm255_vm0, %v1081_v4, %v604_v55 }
 0x2fe   : > { %610 = vst [vmem:[%s240_s16 + $0x8] sm:$0xff] %v608_v57 }
 0x2ff   : > { %863 = shalt.err (!%p860_p4)
}
 0x300   : > { %s864_s13 = scalar_lea.hbm %s1181_s7, 256  ;;  %s868_s12 = scalar_lea.hbm %s1232_s5, 512 }
 0x301   : > { %p865_p5 = scmp.ne.s32.totalorder %s1181_s7, %s864_s13  ;;  %p869_p0 = scmp.lt.u32.totalorder %s1181_s7, %s1232_s5 }
 0x302   : > { %p870_p1 = scmp.lt.u32.totalorder %s868_s12, %s864_s13  ;;  %p872_p6 = scmp.lt.u32.totalorder %s864_s13, %s1181_s7 }
 0x303   : > { %p866_p8 = pnand %p865_p5, %p1249_p11 }
 0x304   : > { %p871_p3 = por %p870_p1, %p869_p0 }
 0x305   : > { %p867_p9 = pneg %p866_p8 }
 0x306   : > { %p873_p12 = por %p872_p6, %p871_p3 }
 0x308   : > { %p874_p13 = pnand %p873_p12, %p867_p9 }
 0x30a   : > { %877 = shalt.err (!%p874_p13)
}
 0x30b   : > { %728 = dma.vmem_to_hbm [thread:$0]  (%p1249_p11), %s1183_s26, 256, %s1181_s7, %s612_s22  }
 0x30c PF: > { %s638_s29 = sand.u32 1, %s904_s18   ;;  %p1250_p7 = scmp.ne.s32.totalorder %s1237_s6, 0 }
 0x30d   : > { %p1251_p10 = scmp.ge.s32.totalorder %s916_s21, 2  ;;  %s639_s16 = scalar_lea.sflag [#allocation4], %s638_s29 }
 0x30f   : > { %p735_p2 = pnand %p1251_p10, %p1250_p7 }
 0x311   : > { %899 = dma.done.wait (!%p735_p2), %s639_s16, 256  }
 0x312   : > { %901 = vsyncadd (!%p735_p2), %s639_s16, 4294967040  ;;  %p18_p4 = scmp.ge.s32.totalorder %s986_s24, 4   ;;  %s1252_s18 = smov %s908_s19 }
 0x313   : > { %s1253_s19 = smov %s912_s20  ;;  %s1254_s20 = smov %s998_s27 }
 0x314   : > { %s1255_s21 = smov %s986_s24  ;;  %20 = sbr.rel (!%p18_p4) target bundleno = 5 (0x5), region = 85 }
 0x31b   :  { %644 = vsyncpa [#allocation3], 1 }
 0x31c   :  { %646 = vsyncpa [#allocation3 + $0x1], 1 }
 0x31d   :  { %647 = vsyncpa [#allocation4], 1 }
 0x31e   :  { %649 = vsyncpa [#allocation4 + $0x1], 1 }

</bundles_post_ra>
